<compile_context>
chip_gen: v7x
topology: tpu7x:2x2x1
jax: 0.10.0
libtpu: 0.0.40
codegen_flags: <defaults>
</compile_context>

<pallas_src>
import functools

import jax
import jax.numpy as jnp
from jax.experimental import pallas as pl
from jax.experimental.pallas import tpu as pltpu

LANES = 128
ACC_ROWS = 8                      # f32 accumulator sublanes (4 KiB accumulator)
TILE_BYTES_PER_INPUT = 2 << 20    # ~2 MiB per input tile per pipeline buffer


def _round_down(x, m):
    return (x // m) * m


def _charbonnier_sum_kernel(pred_ref, targ_ref, out_ref, acc_ref, *, eps2, groups):
    i = pl.program_id(0)

    @pl.when(i == 0)
    def _():
        acc_ref[...] = jnp.zeros_like(acc_ref)

    d = pred_ref[...].astype(jnp.float32) - targ_ref[...].astype(jnp.float32)
    val = jnp.sqrt(d * d + jnp.float32(eps2))
    # (tile_rows, 128) -> (groups, 8, 128) -> sum over leading axis -> (8, 128).
    # Leading-axis sum is pure per-vreg VPU adds (no XLU); the 4 KiB
    # accumulator stays resident in VMEM across the whole grid.
    acc_ref[...] += val.reshape(groups, ACC_ROWS, LANES).sum(axis=0)

    @pl.when(i == pl.num_programs(0) - 1)
    def _():
        out_ref[0, 0] = jnp.sum(acc_ref[...])   # single cross-lane reduce, once


def _charbonnier_sum_ref(pred_flat, targ_flat, eps2):
    d = pred_flat.astype(jnp.float32) - targ_flat.astype(jnp.float32)
    return jnp.sum(jnp.sqrt(d * d + jnp.float32(eps2)))


def charbonnier_loss(pred, target, eps=0.001):
    """Pallas equivalent of CharbonnierLoss(eps)(pred, target) -> scalar mean."""
    assert pred.shape == target.shape
    n_elem = int(pred.size)
    eps2 = float(eps) ** 2

    flat_p = jnp.ravel(pred)
    flat_t = jnp.ravel(target)

    # Dtype-aware geometry (all static Python ints).
    p_item = jnp.dtype(pred.dtype).itemsize
    t_item = jnp.dtype(target.dtype).itemsize
    sublanes = max(ACC_ROWS, 32 // min(p_item, t_item))      # 8 f32 / 16 bf16 / 32 int8
    max_tile_rows = max(
        sublanes,
        _round_down(TILE_BYTES_PER_INPUT // (LANES * max(p_item, t_item)), sublanes),
    )

    rows_full = n_elem // LANES                               # complete 128-lane rows
    tile_rows = min(max_tile_rows, _round_down(rows_full, sublanes))
    if tile_rows == 0:
        tile_rows = _round_down(rows_full, ACC_ROWS)
    n_tiles = (rows_full // tile_rows) if tile_rows > 0 else 0

    if n_tiles == 0:
        # Too small for even one (8, 128) tile: pure-JAX fallback.
        return _charbonnier_sum_ref(flat_p, flat_t, eps2) / jnp.float32(n_elem)

    bulk_rows = n_tiles * tile_rows
    bulk_elems = bulk_rows * LANES
    row_elems = rows_full * LANES

    # Lane-dense slab of complete rows.  Zero-copy reshape when n_elem is
    # 128-aligned; otherwise only the complete-row prefix is sliced
    # (no jnp.pad, no padded copies of both inputs written back to HBM).
    if row_elems == n_elem:
        pred2 = flat_p.reshape(rows_full, LANES)
        targ2 = flat_t.reshape(rows_full, LANES)
    else:
        pred2 = flat_p[:row_elems].reshape(rows_full, LANES)
        targ2 = flat_t[:row_elems].reshape(rows_full, LANES)

    kernel = functools.partial(
        _charbonnier_sum_kernel,
        eps2=eps2,
        groups=tile_rows // ACC_ROWS,
    )

    tile_in_bytes = tile_rows * LANES * (p_item + t_item)
    vmem_limit = int(2 * tile_in_bytes + (8 << 20))   # 2x-buffered inputs + headroom

    partial = pl.pallas_call(
        kernel,
        out_shape=jax.ShapeDtypeStruct((1, 1), jnp.float32),
        grid_spec=pltpu.PrefetchScalarGridSpec(
            num_scalar_prefetch=0,
            grid=(n_tiles,),
            in_specs=[
                # TODO(synk): sweep pipeline_mode=pl.Buffered(3) — pure streaming
                # kernel, one extra tile of VMEM per input is cheap.
                pl.BlockSpec((tile_rows, LANES), lambda i: (i, 0)),
                pl.BlockSpec((tile_rows, LANES), lambda i: (i, 0)),
            ],
            out_specs=pl.BlockSpec((1, 1), lambda i: (0, 0),
                                   memory_space=pltpu.SMEM),
            scratch_shapes=[pltpu.VMEM((ACC_ROWS, LANES), jnp.float32)],
        ),
        compiler_params=pltpu.CompilerParams(
            dimension_semantics=("arbitrary",),
            vmem_limit_bytes=vmem_limit,
        ),
    )(pred2, targ2)

    total = partial[0, 0]
    if bulk_elems < n_elem:
        # Ragged tail (< one tile + 128 elements): tiny plain-JAX reduce.
        total = total + _charbonnier_sum_ref(
            flat_p[bulk_elems:], flat_t[bulk_elems:], eps2)

    return total / jnp.float32(n_elem)


if __name__ == "__main__":
    key = jax.random.PRNGKey(0)
    k1, k2, k3, k4 = jax.random.split(key, 4)

    def ref_loss(p, t, eps=0.001):
        d = p.astype(jnp.float32) - t.astype(jnp.float32)
        return jnp.mean(jnp.sqrt(d * d + eps ** 2))

    # NCHW image pair, 128-aligned element count (pure kernel path).
    pred = jax.random.normal(k1, (2, 4, 16, 16), dtype=jnp.float32)
    target = jax.random.normal(k2, (2, 4, 16, 16), dtype=jnp.float32)
    loss = jax.block_until_ready(charbonnier_loss(pred, target, eps=0.001))
    assert jnp.allclose(loss, ref_loss(pred, target), rtol=1e-5, atol=1e-6), loss

    # Ragged shape: exercises the kernel bulk + plain-JAX tail path.
    pred_r = jax.random.normal(k3, (2, 4, 17, 17), dtype=jnp.float32)
    target_r = jax.random.normal(k4, (2, 4, 17, 17), dtype=jnp.float32)
    loss_r = jax.block_until_ready(charbonnier_loss(pred_r, target_r, eps=0.001))
    assert jnp.allclose(loss_r, ref_loss(pred_r, target_r), rtol=1e-5, atol=1e-6), loss_r

    print("KERNEL_OK")
</pallas_src>

<mosaic_0001>
module attributes {stable_mosaic.version = 11 : i64} {
  func.func @_charbonnier_sum_kernel(%arg0: i32, %arg1: memref<16x128xf32, #tpu.memory_space<vmem>>, %arg2: memref<16x128xf32, #tpu.memory_space<vmem>>, %arg3: memref<1x1xf32, #tpu.memory_space<smem>>, %arg4: memref<8x128xf32, #tpu.memory_space<vmem>>) attributes {dimension_semantics = [#tpu.dimension_semantics<arbitrary>], iteration_bounds = array<i64: 1>, scalar_prefetch = 0 : i64, scratch_operands = 1 : i64, tpu.core_type = #tpu.core_type<tc>, window_params = [{transform_indices = @transform_0, window_bounds = array<i64: 16, 128>}, {transform_indices = @transform_1, window_bounds = array<i64: 16, 128>}, {transform_indices = @transform_2, window_bounds = array<i64: 1, 1>}]} {
    %c0_i32 = arith.constant 0 : i32
    %0 = arith.cmpi eq, %arg0, %c0_i32 : i32
    %1 = arith.extui %0 : i1 to i32
    %c0_i32_0 = arith.constant 0 : i32
    %2 = arith.cmpi ne, %1, %c0_i32_0 : i32
    scf.if %2 {
      %cst_11 = arith.constant 0.000000e+00 : f32
      %18 = vector.broadcast %cst_11 : f32 to vector<8x128xf32>
      %c0_12 = arith.constant 0 : index
      %c0_13 = arith.constant 0 : index
      %19 = vector.load %arg4[%c0_12, %c0_13] : memref<8x128xf32, #tpu.memory_space<vmem>>, vector<8x128xf32>
      tpu.vector_store %arg4[%c0_12, %c0_13], %18 {strides = array<i32>} : memref<8x128xf32, #tpu.memory_space<vmem>>, vector<8x128xf32>,
    } else {
    }
    %c0 = arith.constant 0 : index
    %c0_1 = arith.constant 0 : index
    %3 = vector.load %arg1[%c0, %c0_1] : memref<16x128xf32, #tpu.memory_space<vmem>>, vector<16x128xf32>
    %c0_2 = arith.constant 0 : index
    %c0_3 = arith.constant 0 : index
    %4 = vector.load %arg2[%c0_2, %c0_3] : memref<16x128xf32, #tpu.memory_space<vmem>>, vector<16x128xf32>
    %5 = arith.subf %3, %4 : vector<16x128xf32>
    %6 = arith.mulf %5, %5 : vector<16x128xf32>
    %cst = arith.constant 9.99999997E-7 : f32
    %7 = vector.broadcast %cst : f32 to vector<16x128xf32>
    %8 = arith.addf %6, %7 : vector<16x128xf32>
    %9 = math.sqrt %8 : vector<16x128xf32>
    %c0_4 = arith.constant 0 : index
    %c0_5 = arith.constant 0 : index
    %10 = vector.load %arg4[%c0_4, %c0_5] : memref<8x128xf32, #tpu.memory_space<vmem>>, vector<8x128xf32>
    %11 = vector.shape_cast %9 : vector<16x128xf32> to vector<2x8x128xf32>
    %cst_6 = arith.constant dense<0.000000e+00> : vector<8x128xf32>
    %12 = vector.multi_reduction <add>, %11, %cst_6 [0] : vector<2x8x128xf32> to vector<8x128xf32>
    %13 = arith.addf %10, %12 : vector<8x128xf32>
    %c0_7 = arith.constant 0 : index
    %c0_8 = arith.constant 0 : index
    %14 = vector.load %arg4[%c0_7, %c0_8] : memref<8x128xf32, #tpu.memory_space<vmem>>, vector<8x128xf32>
    tpu.vector_store %arg4[%c0_7, %c0_8], %13 {strides = array<i32>} : memref<8x128xf32, #tpu.memory_space<vmem>>, vector<8x128xf32>,
    %c0_i32_9 = arith.constant 0 : i32
    %15 = arith.cmpi eq, %arg0, %c0_i32_9 : i32
    %16 = arith.extui %15 : i1 to i32
    %c0_i32_10 = arith.constant 0 : i32
    %17 = arith.cmpi ne, %16, %c0_i32_10 : i32
    scf.if %17 {
      %c0_11 = arith.constant 0 : index
      %c0_12 = arith.constant 0 : index
      %18 = vector.load %arg4[%c0_11, %c0_12] : memref<8x128xf32, #tpu.memory_space<vmem>>, vector<8x128xf32>
      %19 = vector.shape_cast %18 : vector<8x128xf32> to vector<1x8x128xf32>
      %cst_13 = arith.constant dense<0.000000e+00> : vector<1xf32>
      %20 = vector.multi_reduction <add>, %19, %cst_13 [1, 2] : vector<1x8x128xf32> to vector<1xf32>
      %21 = vector.shape_cast %20 : vector<1xf32> to vector<1x1x1xf32>
      %22 = vector.extract %21[0, 0, 0] : f32 from vector<1x1x1xf32>
      %c0_14 = arith.constant 0 : index
      %c0_15 = arith.constant 0 : index
      %23 = memref.load %arg3[%c0_14, %c0_15] : memref<1x1xf32, #tpu.memory_space<smem>>
      memref.store %22, %arg3[%c0_14, %c0_15] : memref<1x1xf32, #tpu.memory_space<smem>>
    } else {
    }
    return
  }
  func.func @transform_0(%arg0: i32) -> (i32, i32) {
    %c0_i32 = arith.constant 0 : i32
    %c0_i32_0 = arith.constant 0 : i32
    return %arg0, %c0_i32 : i32, i32
  }
  func.func @transform_1(%arg0: i32) -> (i32, i32) {
    %c0_i32 = arith.constant 0 : i32
    %c0_i32_0 = arith.constant 0 : i32
    return %arg0, %c0_i32 : i32, i32
  }
  func.func @transform_2(%arg0: i32) -> (i32, i32) {
    %c0_i32 = arith.constant 0 : i32
    %c0_i32_0 = arith.constant 0 : i32
    %c0_i32_1 = arith.constant 0 : i32
    return %c0_i32, %c0_i32_0 : i32, i32
  }
}

</mosaic_0001>

<bundles_post_ra>
// kernel: tpu_custom_call.1
= control target key start
LH: loop header
LB: loop body
LE: loop exit
PB: predicated region body
PF: predicated region fallthrough
CT: control target
= control target key end

     0   :  { %7 = vsyncpa [#allocation4], 0  ;;  %s230_s0 = inlined_call_operand.hbm [shape: f32[16,128], index: 0, kind: input, shape index: {}]   ;;  %s231_s1 = inlined_call_operand.hbm [shape: f32[16,128], index: 1, kind: input, shape index: {}]   ;;  %s232_s2 = inlined_call_operand.hbm [shape: f32[1,1], index: 2, kind: output, shape index: {}]  }
   0x1   :  { %8 = vsyncpa [#allocation7], 0 }
   0x2   :  { %9 = vsyncpa [#allocation5], 0  ;;  %s174_s9 = smov [#allocation3]   ;;  %s114_s13 = scalar_lea.hbm %s230_s0, 256 }
   0x3   :  { %s15_s10 = sshll.u32 %s174_s9, 4  ;;  %p115_p0 = scmp.ne.s32.totalorder %s230_s0, %s114_s13  ;;  %s16_s10 = int_to_ptr.vmem [resolvable:$true] %s15_s10 }
   0x4   :  { %p118_p1 = scmp.lt.u32.totalorder %s114_s13, %s230_s0 }
   0x6   :  { %p120_p2 = pnand %p118_p1, %p115_p0 }
   0x8   :  { %123 = shalt.err (!%p120_p2)
}
   0x9   :  { %s124_s18 = scalar_lea.vmem %s16_s10, 256  ;;  %p129_p4 = scmp.lt.s32.totalorder %s16_s10, %s16_s10 }
   0xa   :  { %p125_p3 = scmp.ne.s32.totalorder %s16_s10, %s124_s18  ;;  %p130_p5 = scmp.lt.s32.totalorder %s124_s18, %s124_s18 }
   0xc   :  { %p131_p6 = por %p130_p5, %p129_p4 }
   0xe   :  { %p132_p7 = pnand %p131_p6, %p125_p3 }
  0x10   :  { %135 = shalt.err (!%p132_p7)
}
  0x11   :  { %s175_s19 = smov 128   ;;  %s176_s20 = smov 8  }
  0x12   :  { %21 = dma.hbm_to_vmem [thread:$0]  %s230_s0, 256, %s16_s10, [#allocation4], %s175_s19, %s175_s19, %s176_s20  }
  0x13   :  { %s177_s23 = smov [#allocation6]   ;;  %s136_s27 = scalar_lea.hbm %s231_s1, 256 }
  0x14   :  { %s27_s24 = sshll.u32 %s177_s23, 4  ;;  %p137_p8 = scmp.ne.s32.totalorder %s231_s1, %s136_s27  ;;  %s28_s24 = int_to_ptr.vmem [resolvable:$true] %s27_s24 }
  0x15   :  { %p140_p9 = scmp.lt.u32.totalorder %s136_s27, %s231_s1 }
  0x17   :  { %p142_p10 = pnand %p140_p9, %p137_p8 }
  0x19   :  { %145 = shalt.err (!%p142_p10)
}
  0x1a   :  { %s146_s4 = scalar_lea.vmem %s28_s24, 256  ;;  %p151_p12 = scmp.lt.s32.totalorder %s28_s24, %s28_s24 }
  0x1b   :  { %p147_p11 = scmp.ne.s32.totalorder %s28_s24, %s146_s4  ;;  %p152_p13 = scmp.lt.s32.totalorder %s146_s4, %s146_s4 }
  0x1d   :  { %p153_p0 = por %p152_p13, %p151_p12 }
  0x1f   :  { %p154_p1 = pnand %p153_p0, %p147_p11 }
  0x21   :  { %157 = shalt.err (!%p154_p1)
}
  0x22   :  { %33 = dma.hbm_to_vmem [thread:$0]  %s231_s1, 256, %s28_s24, [#allocation7], %s175_s19, %s175_s19, %s176_s20  }
  0x23   :  { %168 = dma.done.wait [#allocation4], 256  }
  0x24   :  { %169 = vsyncadd [#allocation4], 4294967040 }
  0x25   :  { %170 = dma.done.wait [#allocation7], 256  }
  0x26   :  { %171 = vsyncadd [#allocation7], 4294967040  ;;  %v45_v0 = vld [vmem:[#allocation3] sm:$0xff]  ;;  %v46_v1 = vld [vmem:[#allocation3 + $0x8] sm:$0xff]  ;;  %s158_s8 = scalar_lea.hbm %s232_s2, 16 }
  0x27   :  { %v47_v2 = vld [vmem:[#allocation6] sm:$0xff]  ;;  %v48_v3 = vld [vmem:[#allocation6 + $0x8] sm:$0xff]  ;;  %p159_p2 = scmp.ne.s32.totalorder %s232_s2, %s158_s8  ;;  %p162_p3 = scmp.lt.u32.totalorder %s158_s8, %s232_s2 }
  0x28   :  { %v49_v4 = vsub.f32 %v45_v0, %v47_v2  ;;  %v50_v5 = vsub.f32 %v46_v1, %v48_v3 }
  0x29   :  { %p164_p4 = pnand %p162_p3, %p159_p2 }
  0x2a   :  { %v51_v6 = vmul.f32 %v49_v4, %v49_v4  ;;  %v52_v7 = vmul.f32 %v50_v5, %v50_v5 }
  0x2c   :  { %v53_v8 = vadd.f32 1e-06, %v51_v6  ;;  %v54_v9 = vadd.f32 1e-06, %v52_v7 }
  0x2e   :  { %110 = vrsqrt.f32 %v53_v8  ;;  %vm57_vm0 = vcmp.eq.f32.partialorder %v53_v8, inf  ;;  %v60_v11 = vand.u32 2147483648, %v53_v8  ;;  %vm59_vm1 = vcmp.eq.f32.partialorder %v53_v8, 0.0 }
  0x2f   :  { %112 = vrsqrt.f32 %v54_v9  ;;  %vm64_vm2 = vcmp.eq.f32.partialorder %v54_v9, inf  ;;  %v67_v14 = vand.u32 2147483648, %v54_v9  ;;  %vm66_vm3 = vcmp.eq.f32.partialorder %v54_v9, 0.0 }
  0x38   :  { %v111_v10 = vpop.eup %110 }
  0x39   :  { %v113_v12 = vpop.eup %112  ;;  %v56_v13 = vmul.f32 %v111_v10, %v53_v8 }
  0x3a   :  { %v63_v15 = vmul.f32 %v113_v12, %v54_v9 }
  0x3b   :  { %v58_v16 = vsel %vm57_vm0, %v53_v8, %v56_v13 }
  0x3c   :  { %v61_v17 = vsel %vm59_vm1, %v60_v11, %v58_v16  ;;  %v65_v18 = vsel %vm64_vm2, %v54_v9, %v63_v15 }
  0x3d   :  { %v68_v19 = vsel %vm66_vm3, %v67_v14, %v65_v18 }
  0x3e   :  { %v70_v20 = vadd.f32 %v68_v19, %v61_v17 }
  0x40   :  { %77 = vadd.xlane.f32.xlu0 %v70_v20 }
  0xcd   :  { %v78_v21 = vpop.xlane.xlu0 %77 }
  0xce   :  { %v79_v22 = vrot.slane %v78_v21, 4 }
  0xd0   :  { %v80_v23 = vadd.f32 %v79_v22, %v78_v21 }
  0xd2   :  { %v81_v24 = vrot.slane %v80_v23, 2 }
  0xd4   :  { %v82_v25 = vadd.f32 %v81_v24, %v80_v23 }
  0xd6   :  { %v83_v26 = vrot.slane %v82_v25, 1 }
  0xd8   :  { %v84_v27 = vadd.f32 %v83_v26, %v82_v25 }
  0xda   :  { %103 = vpush %v84_v27 }
 0x10b   :  { %s104_s1 = spop %103 }
 0x10c   :  { %87 = sst [smem:[#allocation8]] %s104_s1 }
 0x10d   :  { %167 = shalt.err (!%p164_p4)
}
 0x10e   :  { %s178_s13 = smov [#allocation8]  }
 0x10f   :  { %95 = dma.smem_to_hbm %s178_s13, 16, %s232_s2, [#allocation5]  }
 0x110   :  { %172 = dma.done.wait [#allocation5], 16  }
 0x111   :  { %173 = vsyncadd [#allocation5], 4294967280 }
 0x112   :  { %99 = sfence }
 0x113   :  { %100 = vsyncpa [#allocation4], 1 }
 0x114   :  { %101 = vsyncpa [#allocation7], 1 }
 0x115   :  { %102 = vsyncpa [#allocation5], 1 }

</bundles_post_ra>
